<compile_context>
chip_gen: v7x
topology: tpu7x:2x2x1
jax: 0.10.0
libtpu: 0.0.40
codegen_flags: <defaults>
</compile_context>

<pallas_src>
import math
import functools

import jax
import jax.numpy as jnp
import numpy as np
from jax.experimental import pallas as pl
from jax.experimental.pallas import tpu as pltpu


# ---------------------------------------------------------------------------
# Buffer setup (plain JAX glue): sinusoidal pe table, exactly like torch __init__.
# ---------------------------------------------------------------------------
def make_positional_encoding_table(max_len: int, d_model: int) -> jnp.ndarray:
    position = jnp.arange(0, max_len, dtype=jnp.float32)[:, None]            # (L, 1)
    div_term = jnp.exp(
        jnp.arange(0, d_model, 2, dtype=jnp.float32) * (-math.log(10000.0) / d_model)
    )
    pe = jnp.zeros((max_len, d_model), dtype=jnp.float32)
    pe = pe.at[:, 0::2].set(jnp.sin(position * div_term))
    if d_model % 2 != 0:
        pe = pe.at[:, 1::2].set(jnp.cos(position * div_term)[:, :-1])
    else:
        pe = pe.at[:, 1::2].set(jnp.cos(position * div_term))
    # torch: pe.unsqueeze(0).transpose(0, 1) -> (max_len, 1, d_model)
    return pe[:, None, :]


def _round_up(n: int, m: int) -> int:
    return ((n + m - 1) // m) * m


# ---------------------------------------------------------------------------
# Pallas kernel: elementwise hot path  y = dropout(x + pe)
#   3-D layout: x_ref (tile_s, B, D), pe_ref (tile_s, 1, D)  -> broadcast add
#   2-D layout: x_ref (tile_s, B*D),  pe_ref (tile_s, D)     -> lane tile (fallback)
# ---------------------------------------------------------------------------
def _posenc_dropout_kernel(seed_ref, x_ref, pe_ref, o_ref, *, p, training, use_hw_prng):
    x = x_ref[...]
    pe = pe_ref[...].astype(x.dtype)

    if x.ndim == 2 and pe.shape[-1] != x.shape[-1]:
        # Fallback slab layout (B not a multiple of the sublane packing):
        # replicate the pe rows across the B copies packed along the lane axis.
        b = x.shape[-1] // pe.shape[-1]
        pe = jnp.tile(pe, (1, b))

    # Main path (3-D): (tile_s, 1, D) broadcasts over the B sublane axis for free.
    y = x + pe

    if training and p > 0.0:
        thr = min(int(round(p * 4294967296.0)), 4294967295)   # P(bits < thr) = p
        if use_hw_prng:
            # Per-step reseed -> grid steps independent & reproducible under
            # "parallel" semantics (v7x 2-TC sharding stays deterministic).
            pltpu.prng_seed(seed_ref[0] + pl.program_id(0))
            bits = pltpu.prng_random_bits(y.shape)
            if bits.dtype != jnp.uint32:
                bits = pltpu.bitcast(bits, jnp.uint32)
        else:
            # Fallback: stateless 2-round integer hash of the global element index.
            # (int32 index may wrap for >2^31 elements: only degrades stream
            # uniqueness, acceptable for dropout.)
            strides = pl.strides_from_shape(y.shape)
            idx = sum(
                jax.lax.broadcasted_iota(jnp.int32, y.shape, ax) * jnp.int32(strides[ax])
                for ax in range(y.ndim)
            )
            h = idx.astype(jnp.uint32) * jnp.uint32(0x9E3779B9)
            h = h + (seed_ref[0].astype(jnp.uint32)
                     + pl.program_id(0).astype(jnp.uint32) * jnp.uint32(0x9E3779B1))
            h = h ^ (h >> 16)
            h = h * jnp.uint32(0x85EBCA6B)
            h = h ^ (h >> 13)
            bits = h

        keep = bits >= jnp.uint32(thr)
        scale = jnp.asarray(1.0 / (1.0 - p), dtype=y.dtype)   # math stays in x dtype
        y = jnp.where(keep, y * scale, jnp.asarray(0, dtype=y.dtype))

    o_ref[...] = y.astype(o_ref.dtype)


# ---------------------------------------------------------------------------
# Wrapper
# ---------------------------------------------------------------------------
def positional_encoding_forward(
    x: jnp.ndarray,          # (S, B, D)
    pe_table: jnp.ndarray,   # (max_len, 1, D)  (full buffer, no per-call slice)
    *,
    p: float = 0.1,
    training: bool = True,
    seed: int = 0,
    target_block_bytes: int = 2 * 1024 * 1024,   # ~2 MiB blocks: safe v5e/v6e/v7x
    use_hw_prng: bool = True,
) -> jnp.ndarray:
    S, B, D = x.shape
    assert pe_table.shape[0] >= S and pe_table.shape[-1] == D
    assert 0.0 <= float(p) < 1.0

    itemsize = jnp.dtype(x.dtype).itemsize
    row_pack = 8 * max(1, 4 // itemsize)      # sublane packing: 8 f32 / 16 bf16 / 32 int8
    pe_cast = pe_table.astype(x.dtype)        # stream pe in x's dtype (no f32 pe traffic)

    # 3-D broadcast layout when B fills whole sublane groups (no padding waste);
    # otherwise fall back to the dense (S, B*D) slab with in-kernel pe tiling.
    use_3d = (B % row_pack == 0)

    if use_3d:
        x_in, pe_in = x, pe_cast
        bytes_per_row = B * _round_up(D, 128) * itemsize
        row_quant = 8                          # seq axis is not a layout axis in 3-D
    else:
        x_in = x.reshape(S, B * D)             # free reshape (contiguous)
        pe_in = pe_cast.reshape(pe_cast.shape[0], D)
        bytes_per_row = _round_up(B * D, 128) * itemsize
        row_quant = row_pack

    # Block sizing: ~target_block_bytes per x block, rows on packing boundaries,
    # capped so the 1-D grid has >=~4 steps (keeps both v7x TensorCores fed).
    tile_s = max(1, target_block_bytes // max(1, bytes_per_row))
    tile_s = max(row_quant, (tile_s // row_quant) * row_quant)
    tile_s = min(tile_s, max(row_quant, _round_up(pl.cdiv(S, 4), row_quant)))
    tile_s = min(tile_s, _round_up(S, row_quant))
    grid = (pl.cdiv(S, tile_s),)

    if use_3d:
        in_specs = [pl.BlockSpec((tile_s, B, D), lambda i, _s: (i, 0, 0)),   # x
                    pl.BlockSpec((tile_s, 1, D), lambda i, _s: (i, 0, 0))]   # pe
        out_spec = pl.BlockSpec((tile_s, B, D), lambda i, _s: (i, 0, 0))
        out_shape = jax.ShapeDtypeStruct((S, B, D), x.dtype)
    else:
        in_specs = [pl.BlockSpec((tile_s, B * D), lambda i, _s: (i, 0)),     # x slab
                    pl.BlockSpec((tile_s, D), lambda i, _s: (i, 0))]         # pe rows
        out_spec = pl.BlockSpec((tile_s, B * D), lambda i, _s: (i, 0))
        out_shape = jax.ShapeDtypeStruct((S, B * D), x.dtype)

    seed_arr = jnp.array([seed], dtype=jnp.int32)

    def run(hw_flag):
        kernel = functools.partial(
            _posenc_dropout_kernel, p=float(p), training=bool(training),
            use_hw_prng=bool(hw_flag))
        out = pl.pallas_call(
            kernel,
            out_shape=out_shape,
            grid_spec=pltpu.PrefetchScalarGridSpec(
                num_scalar_prefetch=1,                      # seed -> SMEM
                grid=grid,
                in_specs=in_specs,
                out_specs=out_spec,
            ),
            compiler_params=pltpu.CompilerParams(
                # Grid steps are independent -> let v7x shard across both TCs.
                dimension_semantics=("parallel",),
                # Headroom for double-buffered x/out blocks + in-kernel
                # uint32 bits / mask temporaries; safe on v5e/v6e/v7x.
                vmem_limit_bytes=32 * 1024 * 1024,
            ),
        )(seed_arr, x_in, pe_in)
        return out if use_3d else out.reshape(S, B, D)

    if training and p > 0.0 and use_hw_prng:
        try:
            return jax.block_until_ready(run(True))
        except Exception:
            # TODO(synk): hardware PRNG not available in this execution mode
            # (e.g. interpret/emulator); fall back to the stateless-hash dropout.
            return run(False)
    return run(use_hw_prng)


# ---------------------------------------------------------------------------
# Demo / self-check
# ---------------------------------------------------------------------------
if __name__ == "__main__":
    d_model = 32
    max_len = 64          # small synthetic max_len (module default is 5000)
    p_drop = 0.1

    pe_table = make_positional_encoding_table(max_len, d_model)

    def check_case(key, S, B):
        x = jax.random.normal(key, (S, B, d_model), dtype=jnp.float32)
        ref = np.asarray(x + pe_table[:S])                       # broadcast (S,1,D) over B

        # Eval mode (dropout = identity): exact math x + pe[:S]
        y_eval = jax.block_until_ready(
            positional_encoding_forward(x, pe_table, p=p_drop, training=False))
        np.testing.assert_allclose(np.asarray(y_eval), ref, rtol=1e-6, atol=1e-6)

        # Train mode (inverted dropout, HW PRNG with hash fallback)
        y_train = jax.block_until_ready(
            positional_encoding_forward(x, pe_table, p=p_drop, training=True, seed=1234))
        yt = np.asarray(y_train)
        assert yt.shape == (S, B, d_model)
        kept = yt != 0.0
        np.testing.assert_allclose(yt[kept], (ref / (1.0 - p_drop))[kept],
                                   rtol=1e-5, atol=1e-5)
        assert 0.7 <= kept.mean() <= 0.995, kept.mean()

    # Case 1: small batch (B=2) -> dense (S, B*D) slab fallback path
    check_case(jax.random.PRNGKey(0), S=8, B=2)
    # Case 2: batch a multiple of 8 -> 3-D broadcast path (no pe tiling / padding)
    check_case(jax.random.PRNGKey(1), S=16, B=8)

    print("KERNEL_OK")
</pallas_src>

<mosaic_0001>
module attributes {stable_mosaic.version = 11 : i64} {
  func.func @_posenc_dropout_kernel(%arg0: i32, %arg1: memref<1xi32, #tpu.memory_space<smem>>, %arg2: memref<8x64xf32, #tpu.memory_space<vmem>>, %arg3: memref<8x32xf32, #tpu.memory_space<vmem>>, %arg4: memref<8x64xf32, #tpu.memory_space<vmem>>) attributes {dimension_semantics = [#tpu.dimension_semantics<parallel>], iteration_bounds = array<i64: 1>, scalar_prefetch = 1 : i64, scratch_operands = 0 : i64, tpu.core_type = #tpu.core_type<tc>, window_params = [{transform_indices = @transform_0, window_bounds = array<i64: 8, 64>}, {transform_indices = @transform_1, window_bounds = array<i64: 8, 32>}, {transform_indices = @transform_2, window_bounds = array<i64: 8, 64>}]} {
    %c0 = arith.constant 0 : index
    %c0_0 = arith.constant 0 : index
    %0 = vector.load %arg2[%c0, %c0_0] : memref<8x64xf32, #tpu.memory_space<vmem>>, vector<8x64xf32>
    %c0_1 = arith.constant 0 : index
    %c0_2 = arith.constant 0 : index
    %1 = vector.load %arg3[%c0_1, %c0_2] : memref<8x32xf32, #tpu.memory_space<vmem>>, vector<8x32xf32>
    %2 = tpu.concatenate %1, %1 in 1 : vector<8x32xf32>, vector<8x32xf32> -> vector<8x64xf32>
    %3 = arith.addf %0, %2 : vector<8x64xf32>
    %c0_3 = arith.constant 0 : index
    %c0_4 = arith.constant 0 : index
    %4 = vector.load %arg4[%c0_3, %c0_4] : memref<8x64xf32, #tpu.memory_space<vmem>>, vector<8x64xf32>
    tpu.vector_store %arg4[%c0_3, %c0_4], %3 {strides = array<i32>} : memref<8x64xf32, #tpu.memory_space<vmem>>, vector<8x64xf32>,
    return
  }
  func.func @transform_0(%arg0: i32, %arg1: memref<1xi32, #tpu.memory_space<smem>>) -> (i32, i32) {
    %c0_i32 = arith.constant 0 : i32
    %c0_i32_0 = arith.constant 0 : i32
    return %arg0, %c0_i32 : i32, i32
  }
  func.func @transform_1(%arg0: i32, %arg1: memref<1xi32, #tpu.memory_space<smem>>) -> (i32, i32) {
    %c0_i32 = arith.constant 0 : i32
    %c0_i32_0 = arith.constant 0 : i32
    return %arg0, %c0_i32 : i32, i32
  }
  func.func @transform_2(%arg0: i32, %arg1: memref<1xi32, #tpu.memory_space<smem>>) -> (i32, i32) {
    %c0_i32 = arith.constant 0 : i32
    %c0_i32_0 = arith.constant 0 : i32
    return %arg0, %c0_i32 : i32, i32
  }
}

</mosaic_0001>

<bundles_post_ra>
// kernel: tpu_custom_call.1
= control target key start
LH: loop header
LB: loop body
LE: loop exit
PB: predicated region body
PF: predicated region fallthrough
CT: control target
= control target key end

     0   :  { %s105_s0 = inlined_call_operand.<no memory space> [shape: s32[1], index: 0, kind: input, shape index: {}]   ;;  %s106_s1 = inlined_call_operand.vmem [shape: f32[8,64], index: 1, kind: input, shape index: {}]   ;;  %s107_s2 = inlined_call_operand.vmem [shape: f32[64,32], index: 2, kind: input, shape index: {}]   ;;  %s108_s3 = inlined_call_operand.hbm [shape: f32[8,64], index: 3, kind: output, shape index: {}]  }
   0x1   :  { %v15_v0 = vld [vmem:[%s107_s2] sm:$0xff] }
   0x2   :  { %9 = vsyncpa [#allocation5], 0  ;;  %s65_s14 = smov 32   ;;  %vm20_vm0 = vcmask 261120   ;;  %v14_v1 = vld [vmem:[%s106_s1] sm:$0xff]  ;;  %s66_s0 = smov [#allocation4]  }
   0x3   :  { %17 = vrot.lane.b32.xlu0 %v15_v0, %s65_s14  ;;  %s31_s17 = sshll.u32 %s66_s0, 4  ;;  %vm23_vm1 = vcmask 523264   ;;  %s32_s17 = int_to_ptr.vmem [resolvable:$true] %s31_s17 }
   0x4   :  { %s41_s18 = scalar_lea.vmem %s32_s17, 128  ;;  %p46_p1 = scmp.lt.s32.totalorder %s32_s17, %s32_s17 }
   0x5   :  { %p42_p0 = scmp.ne.s32.totalorder %s32_s17, %s41_s18  ;;  %p47_p2 = scmp.lt.s32.totalorder %s41_s18, %s41_s18 }
   0x7   :  { %p48_p3 = por %p47_p2, %p46_p1 }
   0x9   :  { %p49_p4 = pnand %p48_p3, %p42_p0 }
  0x75   :  { %v18_v2 = vpop.permute.xlu0 %17 }
  0x76   :  { %v21_v3 = vsel %vm20_vm0, %v15_v0, %v18_v2 }
  0x77   :  { %v22_v4 = vadd.f32 %v21_v3, %v14_v1 }
  0x79   :  { %24 = vst.msk [vmem:[#allocation4] sm:$0xff] %vm23_vm1, %v22_v4 }
  0x7a   :  { %52 = shalt.err (!%p49_p4)
}
  0x7b   :  { %s53_s20 = scalar_lea.hbm %s108_s3, 128 }
  0x7c   :  { %p54_p5 = scmp.ne.s32.totalorder %s108_s3, %s53_s20  ;;  %p57_p6 = scmp.lt.u32.totalorder %s53_s20, %s108_s3 }
  0x7e   :  { %p59_p7 = pnand %p57_p6, %p54_p5 }
  0x80   :  { %62 = shalt.err (!%p59_p7)
}
  0x81   :  { %34 = dma.vmem_to_hbm [thread:$0]  %s32_s17, 128, %s108_s3, [#allocation5]  }
  0x82   :  { %63 = dma.done.wait [#allocation5], 128  }
  0x83   :  { %64 = vsyncadd [#allocation5], 4294967168 }
  0x84   :  { %38 = vsyncpa [#allocation5], 1 }

</bundles_post_ra>
